<compile_context>
chip_gen: v7x
topology: tpu7x:2x2x1
jax: 0.10.0
libtpu: 0.0.40
codegen_flags: <defaults>
</compile_context>

<pallas_src>
import functools

import jax
import jax.numpy as jnp
from jax.experimental import pallas as pl
from jax.experimental.pallas import tpu as pltpu

NUM_JOINTS = 14
NUM_COORDS = 3
FLAT = NUM_JOINTS * NUM_COORDS  # 42
LANES = 128
DEFAULT_BATCH_TILE = 2048       # ~688 KiB/step double-buffered in bf16 -> fine on v7x 64 MiB VMEM


def _round_up(x, m):
    return ((x + m - 1) // m) * m


def _kp3d_sse_kernel(pred_ref, target_ref, mask_ref, out_ref):
    """Per-tile masked sum of squared root-aligned keypoint errors.

    pred_ref, target_ref : (3, 14, TB) wire dtype (bf16/f32), VMEM
    mask_ref             : (1, TB) f32, VMEM (1.0 = valid sample, 0.0 = invalid/pad)
    out_ref              : (1, 128) f32, VMEM (this tile's partial, broadcast over lanes)
    """
    d = pred_ref[...].astype(jnp.float32) - target_ref[...].astype(jnp.float32)  # (3,14,TB)

    # Pelvis of the difference (== difference of pelvises, since alignment is linear):
    # mean of joints 2 and 3, per coordinate, per sample.
    pelvis = (d[:, 2, :] + d[:, 3, :]) * 0.5            # (3, TB)
    ad = d - pelvis[:, None, :]                         # sublane broadcast over joint axis
    sq = ad * ad                                        # (3, 14, TB)

    per_sample = jnp.sum(jnp.sum(sq, axis=0), axis=0, keepdims=True)  # (1, TB)
    partial = jnp.sum(per_sample * mask_ref[...])       # masked SSE for this tile (scalar)

    out_ref[...] = jnp.full((1, LANES), partial, dtype=jnp.float32)


def keypoints3d_loss(pred, target, valid_mask=None, *,
                     batch_tile=DEFAULT_BATCH_TILE, use_pallas=None):
    """pred, target: (B, 14, 3); valid_mask: optional bool (B,). Returns scalar f32."""
    B = pred.shape[0]
    assert pred.shape == (B, NUM_JOINTS, NUM_COORDS), pred.shape
    assert target.shape == (B, NUM_JOINTS, NUM_COORDS), target.shape

    if valid_mask is None:
        mask_f = jnp.ones((B,), jnp.float32)
    else:
        mask_f = valid_mask.astype(jnp.float32)

    if use_pallas is None:
        # At tiny batches the custom-call launch + per-step overhead dominates
        # (~2.7 KB of traffic at B=8); let XLA fuse the elementwise+reduce instead.
        use_pallas = B >= 256
    if not use_pallas:
        return _reference_loss(pred, target, mask_f > 0.0)

    # Keep bf16 on the wire (halves HBM traffic, the actual bottleneck);
    # everything else goes over as f32. Compute is always f32 in-kernel.
    wire_dtype = pred.dtype if pred.dtype in (jnp.bfloat16, jnp.float32) else jnp.float32

    tb = _round_up(min(int(batch_tile), _round_up(B, LANES)), LANES)
    padded_b = _round_up(B, tb)
    num_tiles = padded_b // tb
    pad = padded_b - B

    # (B, 14, 3) -> (3, 14, B): coords lead, joints on sublanes, batch on lanes.
    pred_t = jnp.pad(jnp.transpose(pred.astype(wire_dtype), (2, 1, 0)),
                     ((0, 0), (0, 0), (0, pad)))
    target_t = jnp.pad(jnp.transpose(target.astype(wire_dtype), (2, 1, 0)),
                       ((0, 0), (0, 0), (0, pad)))
    mask_row = jnp.pad(mask_f, (0, pad)).reshape(1, padded_b)   # padded samples masked out

    partial_rows = pl.pallas_call(
        _kp3d_sse_kernel,
        out_shape=jax.ShapeDtypeStruct((1, num_tiles * LANES), jnp.float32),
        grid=(num_tiles,),
        in_specs=[
            pl.BlockSpec((NUM_COORDS, NUM_JOINTS, tb), lambda i: (0, 0, i)),
            pl.BlockSpec((NUM_COORDS, NUM_JOINTS, tb), lambda i: (0, 0, i)),
            pl.BlockSpec((1, tb), lambda i: (0, i)),
        ],
        out_specs=pl.BlockSpec((1, LANES), lambda i: (0, i)),
        compiler_params=pltpu.CompilerParams(
            dimension_semantics=("parallel",),
            vmem_limit_bytes=32 * 1024 * 1024,
        ),
    )(pred_t, target_t, mask_row)

    # Reduce per-tile partials and finalize (count + zero-valid branch) in plain JAX.
    partials = partial_rows.reshape(num_tiles, LANES)[:, 0]
    sse = jnp.sum(partials)
    cnt = jnp.sum(mask_f) * float(FLAT)
    return jnp.where(cnt > 0.0, sse / cnt, jnp.float32(0.0))


def _reference_loss(pred, target, valid_mask=None):
    """Pure-JAX reference mirroring the PyTorch forward (also the small-batch path)."""
    B = pred.shape[0]
    if valid_mask is None:
        valid_mask = jnp.ones((B,), bool)
    m = valid_mask.astype(jnp.float32)

    def align(j):
        pelvis = (j[:, 2, :] + j[:, 3, :]) / 2.0
        return j - pelvis[:, None, :]

    sq = (align(pred.astype(jnp.float32)) - align(target.astype(jnp.float32))) ** 2
    per_sample = jnp.sum(sq, axis=(1, 2))
    cnt = jnp.sum(m) * FLAT
    return jnp.where(cnt > 0, jnp.sum(per_sample * m) / cnt, 0.0)


if __name__ == "__main__":
    key = jax.random.PRNGKey(0)
    kp, kt = jax.random.split(key)

    # Small-shape test through the Pallas kernel (forced).
    B = 8
    pred = jax.random.normal(kp, (B, NUM_JOINTS, NUM_COORDS), dtype=jnp.float32)
    target = jax.random.normal(kt, (B, NUM_JOINTS, NUM_COORDS), dtype=jnp.float32)
    valid_mask = jnp.array([1, 1, 1, 0, 1, 0, 1, 1], dtype=bool)

    loss = keypoints3d_loss(pred, target, valid_mask, use_pallas=True)
    jax.block_until_ready(loss)
    ref = _reference_loss(pred, target, valid_mask)
    assert jnp.allclose(loss, ref, rtol=1e-5, atol=1e-6), (loss, ref)

    # valid_mask=None path through the kernel.
    loss_all = keypoints3d_loss(pred, target, use_pallas=True)
    jax.block_until_ready(loss_all)
    assert jnp.allclose(loss_all, _reference_loss(pred, target), rtol=1e-5, atol=1e-6)

    # All-invalid -> 0.0 path through the kernel.
    loss_none = keypoints3d_loss(pred, target, jnp.zeros((B,), bool), use_pallas=True)
    jax.block_until_ready(loss_none)
    assert jnp.allclose(loss_none, 0.0)

    # Multi-tile grid path (3 tiles of 128 samples) + bf16 wire dtype.
    k1, k2, k3 = jax.random.split(jax.random.PRNGKey(1), 3)
    B2 = 384
    pred2 = jax.random.normal(k1, (B2, NUM_JOINTS, NUM_COORDS), dtype=jnp.float32)
    target2 = jax.random.normal(k2, (B2, NUM_JOINTS, NUM_COORDS), dtype=jnp.float32)
    valid2 = jax.random.bernoulli(k3, 0.7, (B2,))
    loss2 = keypoints3d_loss(pred2, target2, valid2, batch_tile=128, use_pallas=True)
    jax.block_until_ready(loss2)
    ref2 = _reference_loss(pred2, target2, valid2)
    assert jnp.allclose(loss2, ref2, rtol=1e-4, atol=1e-5), (loss2, ref2)

    loss2_bf16 = keypoints3d_loss(pred2.astype(jnp.bfloat16), target2.astype(jnp.bfloat16),
                                  valid2, batch_tile=128, use_pallas=True)
    jax.block_until_ready(loss2_bf16)
    ref2_bf16 = _reference_loss(pred2.astype(jnp.bfloat16), target2.astype(jnp.bfloat16), valid2)
    assert jnp.allclose(loss2_bf16, ref2_bf16, rtol=1e-3, atol=1e-4), (loss2_bf16, ref2_bf16)

    # Default gate: tiny batches take the fused-XLA path (same result).
    loss_small = keypoints3d_loss(pred, target, valid_mask)
    jax.block_until_ready(loss_small)
    assert jnp.allclose(loss_small, ref, rtol=1e-5, atol=1e-6)

    print("KERNEL_OK")
</pallas_src>

<mosaic_0001>
module attributes {stable_mosaic.version = 11 : i64} {
  func.func @_kp3d_sse_kernel(%arg0: i32, %arg1: memref<3x14x128xf32, #tpu.memory_space<vmem>>, %arg2: memref<3x14x128xf32, #tpu.memory_space<vmem>>, %arg3: memref<1x128xf32, #tpu.memory_space<vmem>>, %arg4: memref<1x128xf32, #tpu.memory_space<vmem>>) attributes {dimension_semantics = [#tpu.dimension_semantics<parallel>], iteration_bounds = array<i64: 1>, scalar_prefetch = 0 : i64, scratch_operands = 0 : i64, tpu.core_type = #tpu.core_type<tc>, window_params = [{transform_indices = @transform_0, window_bounds = array<i64: 3, 14, 128>}, {transform_indices = @transform_1, window_bounds = array<i64: 3, 14, 128>}, {transform_indices = @transform_2, window_bounds = array<i64: 1, 128>}, {transform_indices = @transform_3, window_bounds = array<i64: 1, 128>}]} {
    %c0 = arith.constant 0 : index
    %c0_0 = arith.constant 0 : index
    %c0_1 = arith.constant 0 : index
    %0 = vector.load %arg1[%c0, %c0_0, %c0_1] : memref<3x14x128xf32, #tpu.memory_space<vmem>>, vector<3x14x128xf32>
    %c0_2 = arith.constant 0 : index
    %c0_3 = arith.constant 0 : index
    %c0_4 = arith.constant 0 : index
    %1 = vector.load %arg2[%c0_2, %c0_3, %c0_4] : memref<3x14x128xf32, #tpu.memory_space<vmem>>, vector<3x14x128xf32>
    %2 = arith.subf %0, %1 : vector<3x14x128xf32>
    %3 = vector.extract_strided_slice %2 {offsets = [0, 2, 0], sizes = [3, 1, 128], strides = [1, 1, 1]} : vector<3x14x128xf32> to vector<3x1x128xf32>
    %4 = vector.shape_cast %3 : vector<3x1x128xf32> to vector<3x128xf32>
    %5 = vector.extract_strided_slice %2 {offsets = [0, 3, 0], sizes = [3, 1, 128], strides = [1, 1, 1]} : vector<3x14x128xf32> to vector<3x1x128xf32>
    %6 = vector.shape_cast %5 : vector<3x1x128xf32> to vector<3x128xf32>
    %7 = arith.addf %4, %6 : vector<3x128xf32>
    %cst = arith.constant 5.000000e-01 : f32
    %8 = vector.broadcast %cst : f32 to vector<3x128xf32>
    %9 = arith.mulf %7, %8 : vector<3x128xf32>
    %10 = vector.shape_cast %9 : vector<3x128xf32> to vector<3x1x128xf32>
    %11 = vector.broadcast %10 : vector<3x1x128xf32> to vector<3x14x128xf32>
    %12 = arith.subf %2, %11 : vector<3x14x128xf32>
    %13 = arith.mulf %12, %12 : vector<3x14x128xf32>
    %cst_5 = arith.constant dense<0.000000e+00> : vector<14x128xf32>
    %14 = vector.multi_reduction <add>, %13, %cst_5 [0] : vector<3x14x128xf32> to vector<14x128xf32>
    %cst_6 = arith.constant dense<0.000000e+00> : vector<128xf32>
    %15 = vector.multi_reduction <add>, %14, %cst_6 [0] : vector<14x128xf32> to vector<128xf32>
    %16 = vector.shape_cast %15 : vector<128xf32> to vector<1x128xf32>
    %c0_7 = arith.constant 0 : index
    %c0_8 = arith.constant 0 : index
    %17 = vector.load %arg3[%c0_7, %c0_8] : memref<1x128xf32, #tpu.memory_space<vmem>>, vector<1x128xf32>
    %18 = arith.mulf %16, %17 : vector<1x128xf32>
    %19 = vector.shape_cast %18 : vector<1x128xf32> to vector<1x1x128xf32>
    %cst_9 = arith.constant dense<0.000000e+00> : vector<1xf32>
    %20 = vector.multi_reduction <add>, %19, %cst_9 [1, 2] : vector<1x1x128xf32> to vector<1xf32>
    %21 = vector.shape_cast %20 : vector<1xf32> to vector<1x1x1xf32>
    %22 = vector.extract %21[0, 0, 0] : f32 from vector<1x1x1xf32>
    %23 = vector.broadcast %22 : f32 to vector<1x128xf32>
    %c0_10 = arith.constant 0 : index
    %c0_11 = arith.constant 0 : index
    %24 = vector.load %arg4[%c0_10, %c0_11] : memref<1x128xf32, #tpu.memory_space<vmem>>, vector<1x128xf32>
    tpu.vector_store %arg4[%c0_10, %c0_11], %23 {strides = array<i32>} : memref<1x128xf32, #tpu.memory_space<vmem>>, vector<1x128xf32>,
    return
  }
  func.func @transform_0(%arg0: i32) -> (i32, i32, i32) {
    %c0_i32 = arith.constant 0 : i32
    %c0_i32_0 = arith.constant 0 : i32
    %c0_i32_1 = arith.constant 0 : i32
    return %c0_i32, %c0_i32_0, %arg0 : i32, i32, i32
  }
  func.func @transform_1(%arg0: i32) -> (i32, i32, i32) {
    %c0_i32 = arith.constant 0 : i32
    %c0_i32_0 = arith.constant 0 : i32
    %c0_i32_1 = arith.constant 0 : i32
    return %c0_i32, %c0_i32_0, %arg0 : i32, i32, i32
  }
  func.func @transform_2(%arg0: i32) -> (i32, i32) {
    %c0_i32 = arith.constant 0 : i32
    %c0_i32_0 = arith.constant 0 : i32
    return %c0_i32, %arg0 : i32, i32
  }
  func.func @transform_3(%arg0: i32) -> (i32, i32) {
    %c0_i32 = arith.constant 0 : i32
    %c0_i32_0 = arith.constant 0 : i32
    return %c0_i32, %arg0 : i32, i32
  }
}

</mosaic_0001>

<bundles_post_ra>
// kernel: tpu_custom_call.1
= control target key start
LH: loop header
LB: loop body
LE: loop exit
PB: predicated region body
PF: predicated region fallthrough
CT: control target
= control target key end

     0   :  { %8 = vsyncpa [#allocation3], 0  ;;  %s290_s0 = inlined_call_operand.hbm [shape: f32[3,14,128], index: 0, kind: input, shape index: {}]   ;;  %s291_s1 = inlined_call_operand.hbm [shape: f32[3,14,128], index: 1, kind: input, shape index: {}]   ;;  %s292_s2 = inlined_call_operand.vmem [shape: f32[1,128], index: 2, kind: input, shape index: {}]   ;;  %s293_s3 = inlined_call_operand.hbm [shape: f32[1,128], index: 3, kind: output, shape index: {}]  }
   0x1   :  { %9 = vsyncpa [#allocation6], 0 }
   0x2   :  { %10 = vsyncpa [#allocation4], 0  ;;  %s226_s12 = smov [#allocation2]   ;;  %s154_s16 = scalar_lea.hbm %s290_s0, 768 }
   0x3   :  { %s16_s13 = sshll.u32 %s226_s12, 4  ;;  %p155_p0 = scmp.ne.s32.totalorder %s290_s0, %s154_s16  ;;  %s17_s13 = int_to_ptr.vmem [resolvable:$true] %s16_s13 }
   0x4   :  { %p158_p1 = scmp.lt.u32.totalorder %s154_s16, %s290_s0 }
   0x6   :  { %p160_p2 = pnand %p158_p1, %p155_p0 }
   0x8   :  { %163 = shalt.err (!%p160_p2)
}
   0x9   :  { %s164_s21 = scalar_lea.vmem %s17_s13, 768  ;;  %p169_p4 = scmp.lt.s32.totalorder %s17_s13, %s17_s13 }
   0xa   :  { %p165_p3 = scmp.ne.s32.totalorder %s17_s13, %s164_s21  ;;  %p170_p5 = scmp.lt.s32.totalorder %s164_s21, %s164_s21 }
   0xc   :  { %p171_p6 = por %p170_p5, %p169_p4 }
   0xe   :  { %p172_p7 = pnand %p171_p6, %p165_p3 }
  0x10   :  { %175 = shalt.err (!%p172_p7)
}
  0x11   :  { %s227_s22 = smov 128   ;;  %s228_s23 = smov 8  }
  0x12   :  { %22 = dma.hbm_to_vmem [thread:$0]  %s290_s0, 768, %s17_s13, [#allocation3], %s227_s22, %s227_s22, %s228_s23  }
  0x13   :  { %s229_s26 = smov [#allocation5]   ;;  %s176_s30 = scalar_lea.hbm %s291_s1, 768 }
  0x14   :  { %s28_s27 = sshll.u32 %s229_s26, 4  ;;  %p177_p8 = scmp.ne.s32.totalorder %s291_s1, %s176_s30  ;;  %s29_s27 = int_to_ptr.vmem [resolvable:$true] %s28_s27 }
  0x15   :  { %p180_p9 = scmp.lt.u32.totalorder %s176_s30, %s291_s1 }
  0x17   :  { %p182_p10 = pnand %p180_p9, %p177_p8 }
  0x19   :  { %185 = shalt.err (!%p182_p10)
}
  0x1a   :  { %s186_s8 = scalar_lea.vmem %s29_s27, 768  ;;  %p191_p12 = scmp.lt.s32.totalorder %s29_s27, %s29_s27 }
  0x1b   :  { %p187_p11 = scmp.ne.s32.totalorder %s29_s27, %s186_s8  ;;  %p192_p13 = scmp.lt.s32.totalorder %s186_s8, %s186_s8 }
  0x1d   :  { %p193_p0 = por %p192_p13, %p191_p12 }
  0x1f   :  { %p194_p1 = pnand %p193_p0, %p187_p11 }
  0x21   :  { %197 = shalt.err (!%p194_p1)
}
  0x22   :  { %34 = dma.hbm_to_vmem [thread:$0]  %s291_s1, 768, %s29_s27, [#allocation6], %s227_s22, %s227_s22, %s228_s23  }
  0x23   :  { %220 = dma.done.wait [#allocation3], 768  }
  0x24   :  { %221 = vsyncadd [#allocation3], 4294966528 }
  0x25   :  { %222 = dma.done.wait [#allocation6], 768  }
  0x26   :  { %223 = vsyncadd [#allocation6], 4294966528  ;;  %v76_v0 = vlaneseq  ;;  %v43_v1 = vld [vmem:[#allocation2] sm:$0xff]  ;;  %v45_v2 = vld [vmem:[#allocation2 + $0x10] sm:$0xff]  ;;  %vm102_vm0 = vcmask 1045504   ;;  %vm118_vm1 = vcmask 1040384  }
  0x27   :  { %v47_v3 = vld [vmem:[#allocation2 + $0x20] sm:$0xff]  ;;  %v49_v4 = vld [vmem:[#allocation5] sm:$0xff]  ;;  %v44_v11 = vld [vmem:[#allocation2 + $0x8] sm:$0x3f]  ;;  %s230_s11 = smov [#allocation7]  }
  0x28   :  { %v51_v5 = vld [vmem:[#allocation5 + $0x10] sm:$0xff]  ;;  %v53_v6 = vld [vmem:[#allocation5 + $0x20] sm:$0xff]  ;;  %v55_v7 = vsub.f32 %v43_v1, %v49_v4  ;;  %v77_v9 = vshrl.u32 %v76_v0, 7  ;;  %v46_v12 = vld [vmem:[#allocation2 + $0x18] sm:$0x3f]  ;;  %s137_s12 = sshll.u32 %s230_s11, 4  ;;  %s138_s12 = int_to_ptr.vmem [resolvable:$true] %s137_s12 }
  0x29   :  { %v57_v8 = vsub.f32 %v45_v2, %v51_v5  ;;  %v59_v10 = vsub.f32 %v47_v3, %v53_v6  ;;  %v50_v15 = vld [vmem:[#allocation5 + $0x8] sm:$0x3f]  ;;  %v52_v16 = vld [vmem:[#allocation5 + $0x18] sm:$0x3f]  ;;  %v116_v59 = vld [vmem:[%s292_s2] sm:$0x1]  ;;  %p203_p3 = scmp.lt.s32.totalorder %s138_s12, %s138_s12 }
  0x2a   :  { %v64_v13 = vrot.slane %v55_v7, 1  ;;  %v48_v18 = vld [vmem:[#allocation2 + $0x28] sm:$0x3f]  ;;  %v54_v19 = vld [vmem:[#allocation5 + $0x28] sm:$0x3f]  ;;  %v78_v22 = vsub.s32 2, %v77_v9  ;;  %v56_v24 = vsub.f32 %v44_v11, %v50_v15  ;;  %v58_v25 = vsub.f32 %v46_v12, %v52_v16 }
  0x2b   :  { %v65_v14 = vrot.slane %v57_v8, 1  ;;  %v66_v17 = vrot.slane %v59_v10, 1  ;;  %v60_v28 = vsub.f32 %v48_v18, %v54_v19  ;;  %s198_s2 = scalar_lea.vmem %s138_s12, 16  ;;  %s202_s14 = scalar_lea.vmem %s138_s12, 32 }
  0x2c   :  { %v70_v20 = vadd.f32 %v64_v13, %v55_v7  ;;  %p199_p2 = scmp.ne.s32.totalorder %s138_s12, %s198_s2  ;;  %p204_p4 = scmp.lt.s32.totalorder %s202_s14, %s198_s2 }
  0x2d   :  { %v71_v21 = vadd.f32 %v65_v14, %v57_v8  ;;  %v72_v23 = vadd.f32 %v66_v17, %v59_v10 }
  0x2e   :  { %v73_v26 = vmul.f32 0.5, %v70_v20  ;;  %p205_p5 = por %p204_p4, %p203_p3 }
  0x2f   :  { %v74_v27 = vmul.f32 0.5, %v71_v21  ;;  %v75_v29 = vmul.f32 0.5, %v72_v23 }
  0x30   :  { %v79_v30 = vrot.slane %v73_v26, %v78_v22  ;;  %p206_p6 = pnand %p205_p5, %p199_p2 }
  0x31   :  { %v83_v31 = vrot.slane %v74_v27, %v78_v22  ;;  %v87_v32 = vrot.slane %v75_v29, %v78_v22 }
  0x32   :  { %v88_v33 = vsub.f32 %v55_v7, %v79_v30  ;;  %v89_v34 = vsub.f32 %v56_v24, %v79_v30 }
  0x33   :  { %v90_v35 = vsub.f32 %v57_v8, %v83_v31  ;;  %v91_v36 = vsub.f32 %v58_v25, %v83_v31  ;;  %v92_v37 = vsub.f32 %v59_v10, %v87_v32  ;;  %v93_v38 = vsub.f32 %v60_v28, %v87_v32 }
  0x34   :  { %v94_v39 = vmul.f32 %v88_v33, %v88_v33  ;;  %v95_v40 = vmul.f32 %v89_v34, %v89_v34 }
  0x35   :  { %v96_v41 = vmul.f32 %v90_v35, %v90_v35  ;;  %v97_v42 = vmul.f32 %v91_v36, %v91_v36  ;;  %v98_v43 = vmul.f32 %v92_v37, %v92_v37  ;;  %v99_v44 = vmul.f32 %v93_v38, %v93_v38 }
  0x36   :  { %v103_v46 = vsel %vm102_vm0, %v95_v40, 0.0 }
  0x37   :  { %v100_v45 = vadd.f32 %v96_v41, %v94_v39  ;;  %v104_v47 = vsel %vm102_vm0, %v97_v42, 0.0  ;;  %v106_v49 = vsel %vm102_vm0, %v99_v44, 0.0 }
  0x38   :  { %v105_v48 = vadd.f32 %v104_v47, %v103_v46 }
  0x39   :  { %v101_v50 = vadd.f32 %v100_v45, %v98_v43 }
  0x3a   :  { %v107_v51 = vadd.f32 %v106_v49, %v105_v48 }
  0x3c   :  { %v108_v52 = vsel %vm102_vm0, %v107_v51, 0.0 }
  0x3d   :  { %v109_v53 = vadd.f32 %v108_v52, %v101_v50 }
  0x3f   :  { %v110_v54 = vrot.slane %v109_v53, 4 }
  0x41   :  { %v111_v55 = vadd.f32 %v110_v54, %v109_v53 }
  0x43   :  { %v112_v56 = vrot.slane %v111_v55, 2 }
  0x45   :  { %v113_v57 = vadd.f32 %v112_v56, %v111_v55 }
  0x47   :  { %v114_v58 = vrot.slane %v113_v57, 1 }
  0x49   :  { %v115_v60 = vadd.f32 %v114_v58, %v113_v57 }
  0x4b   :  { %v117_v61 = vmul.f32 %v116_v59, %v115_v60 }
  0x4d   :  { %v119_v62 = vsel %vm118_vm1, %v117_v61, 0.0 }
  0x4e   :  { %120 = vadd.xlane.f32.xlu0 %v119_v62 }
  0xdb   :  { %v121_v63 = vpop.xlane.xlu0 %120 }
  0xdc   :  { %v122_v0 = vrot.slane %v121_v63, 4 }
  0xde   :  { %v123_v1 = vadd.f32 %v122_v0, %v121_v63 }
  0xe0   :  { %v124_v2 = vrot.slane %v123_v1, 2 }
  0xe2   :  { %v125_v3 = vadd.f32 %v124_v2, %v123_v1 }
  0xe4   :  { %v126_v4 = vrot.slane %v125_v3, 1 }
  0xe6   :  { %v127_v5 = vadd.f32 %v126_v4, %v125_v3 }
  0xe8   :  { %147 = vpush %v127_v5 }
 0x119   :  { %s148_s13 = spop %147 }
 0x11a   :  { %v129_v6 = vstv %s148_s13 }
 0x11b   :  { %130 = vst [vmem:[#allocation7] sm:$0x1] %v129_v6 }
 0x11c   :  { %209 = shalt.err (!%p206_p6)
}
 0x11d   :  { %s210_s17 = scalar_lea.hbm %s293_s3, 16 }
 0x11e   :  { %p211_p7 = scmp.ne.s32.totalorder %s293_s3, %s210_s17  ;;  %p214_p8 = scmp.lt.u32.totalorder %s210_s17, %s293_s3 }
 0x120   :  { %p216_p9 = pnand %p214_p8, %p211_p7 }
 0x122   :  { %219 = shalt.err (!%p216_p9)
}
 0x123   :  { %140 = dma.vmem_to_hbm [thread:$0]  %s138_s12, 16, %s293_s3, [#allocation4]  }
 0x124   :  { %224 = dma.done.wait [#allocation4], 16  }
 0x125   :  { %225 = vsyncadd [#allocation4], 4294967280 }
 0x126   :  { %144 = vsyncpa [#allocation3], 1 }
 0x127   :  { %145 = vsyncpa [#allocation6], 1 }
 0x128   :  { %146 = vsyncpa [#allocation4], 1 }

</bundles_post_ra>
